<compile_context>
chip_gen: v5e
topology: v5e:2x2
jax: 0.10.0
libtpu: 0.0.40
codegen_flags: <defaults>
</compile_context>

<pallas_src>
import jax
import jax.numpy as jnp
from jax import lax
from jax.experimental import pallas as pl
from jax.experimental.pallas import tpu as pltpu


# Tap order matches the flattened PyTorch weight: t = (dy+1)*3 + (dx+1).
_TAPS = tuple((dy, dx) for dy in (-1, 0, 1) for dx in (-1, 0, 1))


def _tree_sum(xs):
    """Balanced binary add tree (exposes ILP to the 4 VALU slots)."""
    xs = list(xs)
    while len(xs) > 1:
        nxt = [xs[i] + xs[i + 1] for i in range(0, len(xs) - 1, 2)]
        if len(xs) % 2:
            nxt.append(xs[-1])
        xs = nxt
    return xs[0]


def _make_disphead_kernel(C, CC, H, W, fuse_upsample):
    HW = H * W
    n_c_steps = C // CC

    def emit_output(taps, b_ref, o_ref):
        """taps: list of 9 (1, HW) f32 channel-weighted tap sums (unshifted)."""
        # Hoisted position masks (built once; applied at most 8 + 4 times).
        flat = lax.broadcasted_iota(jnp.int32, (1, HW), 1)
        not_top = flat >= W                  # global row >= 1 (no div needed)
        not_bot = flat < (H - 1) * W         # global row <= H-2
        # TODO(synk): for non-power-of-two W, precompute the column masks
        # outside the div/mod path (here W is a compile-time constant).
        col = flat % W
        not_lft = col >= 1
        not_rgt = col <= W - 2
        row_ok = {-1: not_top, 0: None, 1: not_bot}
        col_ok = {-1: not_lft, 0: None, 1: not_rgt}

        # One roll + one masked select per tap (zero padding of the conv).
        shifted = []
        for t, (dy, dx) in enumerate(_TAPS):
            d = dy * W + dx                                  # flat lane shift
            s = taps[t] if d == 0 else jnp.roll(taps[t], -d, axis=1)
            m = row_ok[dy]
            if col_ok[dx] is not None:
                m = col_ok[dx] if m is None else (m & col_ok[dx])
            if m is not None:
                s = jnp.where(m, s, 0.0)
            shifted.append(s)

        y = jax.nn.sigmoid(_tree_sum(shifted) + b_ref[0])    # (1, HW), EUP

        if not fuse_upsample:
            o_ref[...] = y
            return

        # Fused 2x bilinear upsample (align_corners=False): separable
        # [0.25, 0.75] polyphase filter with replicate (clamp) boundary.
        # Plane p = 2*pr + pc holds up[2h+pr, 2w+pc] at lane h*W + w.
        def shift_rep(z, d, mask):
            return jnp.where(mask, jnp.roll(z, -d, axis=1), z)

        up = shift_rep(y, -W, not_top)       # value at (h-1, w)
        dn = shift_rep(y, W, not_bot)        # value at (h+1, w)
        rows = (0.25 * up + 0.75 * y,        # output rows 2h   (pr=0)
                0.75 * y + 0.25 * dn)        # output rows 2h+1 (pr=1)
        for pr, z in enumerate(rows):
            lf = shift_rep(z, -1, not_lft)   # value at (., w-1)
            rt = shift_rep(z, 1, not_rgt)    # value at (., w+1)
            o_ref[pl.ds(2 * pr + 0, 1), :] = 0.25 * lf + 0.75 * z  # cols 2w
            o_ref[pl.ds(2 * pr + 1, 1), :] = 0.75 * z + 0.25 * rt  # cols 2w+1

    def kernel(x_ref, w_ref, b_ref, o_ref, tap_ref):
        # x_ref  : (CC, HW) VMEM  - one sample, CC channels, lane-flat plane
        # w_ref  : (C*9,)   SMEM  - weight[c, t], t = (dy+1)*3 + (dx+1)
        # b_ref  : (1,)     SMEM
        # o_ref  : (4, HW) VMEM if fuse_upsample else (1, HW)
        # tap_ref: (9, HW)  VMEM f32 scratch - tap partials across C chunks
        if n_c_steps == 1:
            base = 0
        else:
            cstep = pl.program_id(1)
            base = cstep * (CC * 9)

        # Channel-weighted per-tap sums for this chunk: scalar(SMEM) x vreg
        # mul/adds into 9 independent accumulators (no rolls/masks here).
        xc = x_ref[pl.ds(0, 1), :].astype(jnp.float32)       # (1, HW)
        parts = [xc * w_ref[base + t] for t in range(9)]
        for c in range(1, CC):
            xc = x_ref[pl.ds(c, 1), :].astype(jnp.float32)
            for t in range(9):
                parts[t] = parts[t] + xc * w_ref[base + c * 9 + t]

        if n_c_steps == 1:
            emit_output(parts, b_ref, o_ref)
            return

        @pl.when(cstep == 0)
        def _():
            for t in range(9):
                tap_ref[pl.ds(t, 1), :] = parts[t]

        @pl.when(cstep > 0)
        def _():
            for t in range(9):
                tap_ref[pl.ds(t, 1), :] = tap_ref[pl.ds(t, 1), :] + parts[t]

        @pl.when(cstep == n_c_steps - 1)
        def _():
            emit_output([tap_ref[pl.ds(t, 1), :] for t in range(9)], b_ref, o_ref)

    return kernel


def _pick_c_chunk(C, requested=None, max_chunk=32):
    """Channel-chunk size: must divide C; multiples of 8 (sublanes) preferred."""
    if requested is not None:
        if C % requested != 0:
            raise ValueError(f"c_chunk={requested} must divide C={C}")
        return requested
    if C <= max_chunk:
        return C
    for cc in range(max_chunk, 7, -8):       # 32, 24, 16, 8
        if C % cc == 0:
            return cc
    return C                                 # fall back: whole C in one step


def disphead_forward(x, weight, bias, scale, *, c_chunk=None):
    """DispHead forward. x: (N,C,H,W), weight: (1,C,3,3), bias: (1,).

    Returns (N, 1, H*scale, W*scale) float32 (conv -> sigmoid -> upsample)."""
    N, C, H, W = x.shape
    HW = H * W
    fuse_up = (scale == 2)
    CC = _pick_c_chunk(C, c_chunk)
    n_c = C // CC

    x_flat = x.reshape(N, C, HW)                         # free reshape (no copy)
    w_flat = weight.reshape(C * 9).astype(jnp.float32)   # c*9 + (dy+1)*3 + (dx+1)
    b = bias.reshape(1).astype(jnp.float32)

    if fuse_up:
        out_shape = jax.ShapeDtypeStruct((N, 4, HW), jnp.float32)
        out_spec = pl.BlockSpec((None, 4, HW), lambda n, c: (n, 0, 0))
    else:
        out_shape = jax.ShapeDtypeStruct((N, 1, HW), jnp.float32)
        out_spec = pl.BlockSpec((None, 1, HW), lambda n, c: (n, 0, 0))

    # Raise the scoped-VMEM limit only when the double-buffered blocks need it
    # (v5e default 16 MiB is the smallest).  Capped with headroom.
    in_bytes = CC * HW * x.dtype.itemsize
    out_bytes = (4 if fuse_up else 1) * HW * 4
    scratch_bytes = 16 * HW * 4
    need = 2 * (in_bytes + out_bytes) + scratch_bytes
    cp_kwargs = dict(dimension_semantics=("parallel", "arbitrary"))
    if need > 16 * 1024 * 1024:
        cp_kwargs["vmem_limit_bytes"] = min(int(need * 1.5) + (4 << 20), 100 << 20)

    out = pl.pallas_call(
        _make_disphead_kernel(C, CC, H, W, fuse_up),
        out_shape=out_shape,
        grid=(N, n_c),                       # batch parallel, C-chunk reduction last
        in_specs=[
            pl.BlockSpec((None, CC, HW), lambda n, c: (n, c, 0)),
            pl.BlockSpec(memory_space=pltpu.MemorySpace.SMEM),
            pl.BlockSpec(memory_space=pltpu.MemorySpace.SMEM),
        ],
        out_specs=out_spec,
        scratch_shapes=[pltpu.VMEM((9, HW), jnp.float32)],
        compiler_params=pltpu.CompilerParams(**cp_kwargs),
    )(x_flat, w_flat, b)

    if fuse_up:
        # De-interleave the 4 phase planes into (N, 1, 2H, 2W).
        # TODO(synk): at production sizes, compare this wrapper-side XLA pass
        # against an in-kernel XLU lane/sublane interleave (or keep the
        # phase-plane layout if the consumer accepts it).
        return (out.reshape(N, 2, 2, H, W)
                   .transpose(0, 3, 1, 4, 2)
                   .reshape(N, 1, 2 * H, 2 * W))

    y = out.reshape(N, 1, H, W)
    if scale > 1:
        # TODO(synk): only the module's default scale==2 is fused in-kernel;
        # other scales fall back to plain-JAX bilinear outside the kernel.
        y = bilinear_upsample(y, scale)
    return y


def bilinear_upsample(x, scale):
    """PyTorch F.interpolate(mode='bilinear', align_corners=False) for NCHW.
    Used as reference and as fallback for scale not in (1, 2)."""
    N, C, H, W = x.shape
    Ho, Wo = H * scale, W * scale

    def coords(out_size, in_size):
        s = (jnp.arange(out_size, dtype=jnp.float32) + 0.5) * (in_size / out_size) - 0.5
        s = jnp.maximum(s, 0.0)
        i0 = jnp.minimum(jnp.floor(s).astype(jnp.int32), in_size - 1)
        i1 = jnp.minimum(i0 + 1, in_size - 1)
        w1 = jnp.clip(s - i0.astype(jnp.float32), 0.0, 1.0)
        return i0, i1, w1

    h0, h1, wh = coords(Ho, H)
    w0, w1, ww = coords(Wo, W)

    top = x[:, :, h0, :]
    bot = x[:, :, h1, :]
    rows = top * (1.0 - wh)[None, None, :, None] + bot * wh[None, None, :, None]
    left = rows[:, :, :, w0]
    right = rows[:, :, :, w1]
    return left * (1.0 - ww) + right * ww


def _reference(x, weight, bias, scale):
    y = jax.nn.sigmoid(
        lax.conv_general_dilated(
            x, weight, (1, 1), ((1, 1), (1, 1)),
            dimension_numbers=("NCHW", "OIHW", "NCHW"))
        + bias.reshape(1, 1, 1, 1))
    return bilinear_upsample(y, scale) if scale > 1 else y


if __name__ == "__main__":
    key = jax.random.PRNGKey(0)

    configs = [
        dict(N=2, C=4, H=16, W=16, scale=2, c_chunk=None),   # fused 2x upsample
        dict(N=2, C=4, H=16, W=16, scale=1, c_chunk=None),   # conv + sigmoid only
        dict(N=1, C=16, H=16, W=16, scale=2, c_chunk=8),     # multi C-chunk reduction path
    ]

    for i, cfg in enumerate(configs):
        k = jax.random.fold_in(key, i)
        kx, kw, kb = jax.random.split(k, 3)
        x = jax.random.normal(kx, (cfg["N"], cfg["C"], cfg["H"], cfg["W"]),
                              dtype=jnp.float32)
        weight = 0.1 * jax.random.normal(kw, (1, cfg["C"], 3, 3), dtype=jnp.float32)
        bias = 0.1 * jax.random.normal(kb, (1,), dtype=jnp.float32)

        out = jax.block_until_ready(
            disphead_forward(x, weight, bias, cfg["scale"], c_chunk=cfg["c_chunk"]))
        ref = _reference(x, weight, bias, cfg["scale"])
        assert out.shape == ref.shape, (i, out.shape, ref.shape)
        err = float(jnp.max(jnp.abs(out - ref)))
        assert jnp.allclose(out, ref, atol=1e-5, rtol=1e-5), (i, err)

    print("KERNEL_OK")
</pallas_src>

<mosaic_0001>
module attributes {stable_mosaic.version = 11 : i64} {
  func.func @kernel(%arg0: i32, %arg1: i32, %arg2: memref<1x4x256xf32, #tpu.memory_space<vmem>>, %arg3: memref<36xf32, #tpu.memory_space<smem>>, %arg4: memref<1xf32, #tpu.memory_space<smem>>, %arg5: memref<1x4x256xf32, #tpu.memory_space<vmem>>, %arg6: memref<9x256xf32, #tpu.memory_space<vmem>>) attributes {dimension_semantics = [#tpu.dimension_semantics<parallel>, #tpu.dimension_semantics<arbitrary>], iteration_bounds = array<i64: 2, 1>, scalar_prefetch = 0 : i64, scratch_operands = 1 : i64, tpu.core_type = #tpu.core_type<tc>, window_params = [{transform_indices = @transform_0, window_bounds = array<i64: 1, 4, 256>}, {transform_indices = @transform_1, window_bounds = array<i64: 36>}, {transform_indices = @transform_2, window_bounds = array<i64: 1>}, {transform_indices = @transform_3, window_bounds = array<i64: 1, 4, 256>}]} {
    %c0 = arith.constant 0 : index
    %c0_0 = arith.constant 0 : index
    %c0_1 = arith.constant 0 : index
    %0 = vector.load %arg2[%c0, %c0_0, %c0_1] : memref<1x4x256xf32, #tpu.memory_space<vmem>>, vector<1x1x256xf32>
    %1 = vector.shape_cast %0 : vector<1x1x256xf32> to vector<1x256xf32>
    %c0_2 = arith.constant 0 : index
    %2 = memref.load %arg3[%c0_2] : memref<36xf32, #tpu.memory_space<smem>>
    %3 = vector.broadcast %2 : f32 to vector<1x256xf32>
    %4 = arith.mulf %1, %3 : vector<1x256xf32>
    %c1 = arith.constant 1 : index
    %5 = memref.load %arg3[%c1] : memref<36xf32, #tpu.memory_space<smem>>
    %6 = vector.broadcast %5 : f32 to vector<1x256xf32>
    %7 = arith.mulf %1, %6 : vector<1x256xf32>
    %c2 = arith.constant 2 : index
    %8 = memref.load %arg3[%c2] : memref<36xf32, #tpu.memory_space<smem>>
    %9 = vector.broadcast %8 : f32 to vector<1x256xf32>
    %10 = arith.mulf %1, %9 : vector<1x256xf32>
    %c3 = arith.constant 3 : index
    %11 = memref.load %arg3[%c3] : memref<36xf32, #tpu.memory_space<smem>>
    %12 = vector.broadcast %11 : f32 to vector<1x256xf32>
    %13 = arith.mulf %1, %12 : vector<1x256xf32>
    %c4 = arith.constant 4 : index
    %14 = memref.load %arg3[%c4] : memref<36xf32, #tpu.memory_space<smem>>
    %15 = vector.broadcast %14 : f32 to vector<1x256xf32>
    %16 = arith.mulf %1, %15 : vector<1x256xf32>
    %c5 = arith.constant 5 : index
    %17 = memref.load %arg3[%c5] : memref<36xf32, #tpu.memory_space<smem>>
    %18 = vector.broadcast %17 : f32 to vector<1x256xf32>
    %19 = arith.mulf %1, %18 : vector<1x256xf32>
    %c6 = arith.constant 6 : index
    %20 = memref.load %arg3[%c6] : memref<36xf32, #tpu.memory_space<smem>>
    %21 = vector.broadcast %20 : f32 to vector<1x256xf32>
    %22 = arith.mulf %1, %21 : vector<1x256xf32>
    %c7 = arith.constant 7 : index
    %23 = memref.load %arg3[%c7] : memref<36xf32, #tpu.memory_space<smem>>
    %24 = vector.broadcast %23 : f32 to vector<1x256xf32>
    %25 = arith.mulf %1, %24 : vector<1x256xf32>
    %c8 = arith.constant 8 : index
    %26 = memref.load %arg3[%c8] : memref<36xf32, #tpu.memory_space<smem>>
    %27 = vector.broadcast %26 : f32 to vector<1x256xf32>
    %28 = arith.mulf %1, %27 : vector<1x256xf32>
    %c0_3 = arith.constant 0 : index
    %c1_4 = arith.constant 1 : index
    %c0_5 = arith.constant 0 : index
    %29 = vector.load %arg2[%c0_3, %c1_4, %c0_5] : memref<1x4x256xf32, #tpu.memory_space<vmem>>, vector<1x1x256xf32>
    %30 = vector.shape_cast %29 : vector<1x1x256xf32> to vector<1x256xf32>
    %c9 = arith.constant 9 : index
    %31 = memref.load %arg3[%c9] : memref<36xf32, #tpu.memory_space<smem>>
    %32 = vector.broadcast %31 : f32 to vector<1x256xf32>
    %33 = arith.mulf %30, %32 : vector<1x256xf32>
    %34 = arith.addf %4, %33 : vector<1x256xf32>
    %c10 = arith.constant 10 : index
    %35 = memref.load %arg3[%c10] : memref<36xf32, #tpu.memory_space<smem>>
    %36 = vector.broadcast %35 : f32 to vector<1x256xf32>
    %37 = arith.mulf %30, %36 : vector<1x256xf32>
    %38 = arith.addf %7, %37 : vector<1x256xf32>
    %c11 = arith.constant 11 : index
    %39 = memref.load %arg3[%c11] : memref<36xf32, #tpu.memory_space<smem>>
    %40 = vector.broadcast %39 : f32 to vector<1x256xf32>
    %41 = arith.mulf %30, %40 : vector<1x256xf32>
    %42 = arith.addf %10, %41 : vector<1x256xf32>
    %c12 = arith.constant 12 : index
    %43 = memref.load %arg3[%c12] : memref<36xf32, #tpu.memory_space<smem>>
    %44 = vector.broadcast %43 : f32 to vector<1x256xf32>
    %45 = arith.mulf %30, %44 : vector<1x256xf32>
    %46 = arith.addf %13, %45 : vector<1x256xf32>
    %c13 = arith.constant 13 : index
    %47 = memref.load %arg3[%c13] : memref<36xf32, #tpu.memory_space<smem>>
    %48 = vector.broadcast %47 : f32 to vector<1x256xf32>
    %49 = arith.mulf %30, %48 : vector<1x256xf32>
    %50 = arith.addf %16, %49 : vector<1x256xf32>
    %c14 = arith.constant 14 : index
    %51 = memref.load %arg3[%c14] : memref<36xf32, #tpu.memory_space<smem>>
    %52 = vector.broadcast %51 : f32 to vector<1x256xf32>
    %53 = arith.mulf %30, %52 : vector<1x256xf32>
    %54 = arith.addf %19, %53 : vector<1x256xf32>
    %c15 = arith.constant 15 : index
    %55 = memref.load %arg3[%c15] : memref<36xf32, #tpu.memory_space<smem>>
    %56 = vector.broadcast %55 : f32 to vector<1x256xf32>
    %57 = arith.mulf %30, %56 : vector<1x256xf32>
    %58 = arith.addf %22, %57 : vector<1x256xf32>
    %c16 = arith.constant 16 : index
    %59 = memref.load %arg3[%c16] : memref<36xf32, #tpu.memory_space<smem>>
    %60 = vector.broadcast %59 : f32 to vector<1x256xf32>
    %61 = arith.mulf %30, %60 : vector<1x256xf32>
    %62 = arith.addf %25, %61 : vector<1x256xf32>
    %c17 = arith.constant 17 : index
    %63 = memref.load %arg3[%c17] : memref<36xf32, #tpu.memory_space<smem>>
    %64 = vector.broadcast %63 : f32 to vector<1x256xf32>
    %65 = arith.mulf %30, %64 : vector<1x256xf32>
    %66 = arith.addf %28, %65 : vector<1x256xf32>
    %c0_6 = arith.constant 0 : index
    %c2_7 = arith.constant 2 : index
    %c0_8 = arith.constant 0 : index
    %67 = vector.load %arg2[%c0_6, %c2_7, %c0_8] : memref<1x4x256xf32, #tpu.memory_space<vmem>>, vector<1x1x256xf32>
    %68 = vector.shape_cast %67 : vector<1x1x256xf32> to vector<1x256xf32>
    %c18 = arith.constant 18 : index
    %69 = memref.load %arg3[%c18] : memref<36xf32, #tpu.memory_space<smem>>
    %70 = vector.broadcast %69 : f32 to vector<1x256xf32>
    %71 = arith.mulf %68, %70 : vector<1x256xf32>
    %72 = arith.addf %34, %71 : vector<1x256xf32>
    %c19 = arith.constant 19 : index
    %73 = memref.load %arg3[%c19] : memref<36xf32, #tpu.memory_space<smem>>
    %74 = vector.broadcast %73 : f32 to vector<1x256xf32>
    %75 = arith.mulf %68, %74 : vector<1x256xf32>
    %76 = arith.addf %38, %75 : vector<1x256xf32>
    %c20 = arith.constant 20 : index
    %77 = memref.load %arg3[%c20] : memref<36xf32, #tpu.memory_space<smem>>
    %78 = vector.broadcast %77 : f32 to vector<1x256xf32>
    %79 = arith.mulf %68, %78 : vector<1x256xf32>
    %80 = arith.addf %42, %79 : vector<1x256xf32>
    %c21 = arith.constant 21 : index
    %81 = memref.load %arg3[%c21] : memref<36xf32, #tpu.memory_space<smem>>
    %82 = vector.broadcast %81 : f32 to vector<1x256xf32>
    %83 = arith.mulf %68, %82 : vector<1x256xf32>
    %84 = arith.addf %46, %83 : vector<1x256xf32>
    %c22 = arith.constant 22 : index
    %85 = memref.load %arg3[%c22] : memref<36xf32, #tpu.memory_space<smem>>
    %86 = vector.broadcast %85 : f32 to vector<1x256xf32>
    %87 = arith.mulf %68, %86 : vector<1x256xf32>
    %88 = arith.addf %50, %87 : vector<1x256xf32>
    %c23 = arith.constant 23 : index
    %89 = memref.load %arg3[%c23] : memref<36xf32, #tpu.memory_space<smem>>
    %90 = vector.broadcast %89 : f32 to vector<1x256xf32>
    %91 = arith.mulf %68, %90 : vector<1x256xf32>
    %92 = arith.addf %54, %91 : vector<1x256xf32>
    %c24 = arith.constant 24 : index
    %93 = memref.load %arg3[%c24] : memref<36xf32, #tpu.memory_space<smem>>
    %94 = vector.broadcast %93 : f32 to vector<1x256xf32>
    %95 = arith.mulf %68, %94 : vector<1x256xf32>
    %96 = arith.addf %58, %95 : vector<1x256xf32>
    %c25 = arith.constant 25 : index
    %97 = memref.load %arg3[%c25] : memref<36xf32, #tpu.memory_space<smem>>
    %98 = vector.broadcast %97 : f32 to vector<1x256xf32>
    %99 = arith.mulf %68, %98 : vector<1x256xf32>
    %100 = arith.addf %62, %99 : vector<1x256xf32>
    %c26 = arith.constant 26 : index
    %101 = memref.load %arg3[%c26] : memref<36xf32, #tpu.memory_space<smem>>
    %102 = vector.broadcast %101 : f32 to vector<1x256xf32>
    %103 = arith.mulf %68, %102 : vector<1x256xf32>
    %104 = arith.addf %66, %103 : vector<1x256xf32>
    %c0_9 = arith.constant 0 : index
    %c3_10 = arith.constant 3 : index
    %c0_11 = arith.constant 0 : index
    %105 = vector.load %arg2[%c0_9, %c3_10, %c0_11] : memref<1x4x256xf32, #tpu.memory_space<vmem>>, vector<1x1x256xf32>
    %106 = vector.shape_cast %105 : vector<1x1x256xf32> to vector<1x256xf32>
    %c27 = arith.constant 27 : index
    %107 = memref.load %arg3[%c27] : memref<36xf32, #tpu.memory_space<smem>>
    %108 = vector.broadcast %107 : f32 to vector<1x256xf32>
    %109 = arith.mulf %106, %108 : vector<1x256xf32>
    %110 = arith.addf %72, %109 : vector<1x256xf32>
    %c28 = arith.constant 28 : index
    %111 = memref.load %arg3[%c28] : memref<36xf32, #tpu.memory_space<smem>>
    %112 = vector.broadcast %111 : f32 to vector<1x256xf32>
    %113 = arith.mulf %106, %112 : vector<1x256xf32>
    %114 = arith.addf %76, %113 : vector<1x256xf32>
    %c29 = arith.constant 29 : index
    %115 = memref.load %arg3[%c29] : memref<36xf32, #tpu.memory_space<smem>>
    %116 = vector.broadcast %115 : f32 to vector<1x256xf32>
    %117 = arith.mulf %106, %116 : vector<1x256xf32>
    %118 = arith.addf %80, %117 : vector<1x256xf32>
    %c30 = arith.constant 30 : index
    %119 = memref.load %arg3[%c30] : memref<36xf32, #tpu.memory_space<smem>>
    %120 = vector.broadcast %119 : f32 to vector<1x256xf32>
    %121 = arith.mulf %106, %120 : vector<1x256xf32>
    %122 = arith.addf %84, %121 : vector<1x256xf32>
    %c31 = arith.constant 31 : index
    %123 = memref.load %arg3[%c31] : memref<36xf32, #tpu.memory_space<smem>>
    %124 = vector.broadcast %123 : f32 to vector<1x256xf32>
    %125 = arith.mulf %106, %124 : vector<1x256xf32>
    %126 = arith.addf %88, %125 : vector<1x256xf32>
    %c32 = arith.constant 32 : index
    %127 = memref.load %arg3[%c32] : memref<36xf32, #tpu.memory_space<smem>>
    %128 = vector.broadcast %127 : f32 to vector<1x256xf32>
    %129 = arith.mulf %106, %128 : vector<1x256xf32>
    %130 = arith.addf %92, %129 : vector<1x256xf32>
    %c33 = arith.constant 33 : index
    %131 = memref.load %arg3[%c33] : memref<36xf32, #tpu.memory_space<smem>>
    %132 = vector.broadcast %131 : f32 to vector<1x256xf32>
    %133 = arith.mulf %106, %132 : vector<1x256xf32>
    %134 = arith.addf %96, %133 : vector<1x256xf32>
    %c34 = arith.constant 34 : index
    %135 = memref.load %arg3[%c34] : memref<36xf32, #tpu.memory_space<smem>>
    %136 = vector.broadcast %135 : f32 to vector<1x256xf32>
    %137 = arith.mulf %106, %136 : vector<1x256xf32>
    %138 = arith.addf %100, %137 : vector<1x256xf32>
    %c35 = arith.constant 35 : index
    %139 = memref.load %arg3[%c35] : memref<36xf32, #tpu.memory_space<smem>>
    %140 = vector.broadcast %139 : f32 to vector<1x256xf32>
    %141 = arith.mulf %106, %140 : vector<1x256xf32>
    %142 = arith.addf %104, %141 : vector<1x256xf32>
    %143 = tpu.iota {dimensions = array<i32: 1>} : vector<1x256xi32>
    %c16_i32 = arith.constant 16 : i32
    %144 = vector.broadcast %c16_i32 : i32 to vector<1x256xi32>
    %145 = arith.cmpi sge, %143, %144 : vector<1x256xi32>
    %c240_i32 = arith.constant 240 : i32
    %146 = vector.broadcast %c240_i32 : i32 to vector<1x256xi32>
    %147 = arith.cmpi slt, %143, %146 : vector<1x256xi32>
    %c16_i32_12 = arith.constant 16 : i32
    %c0_i32 = arith.constant 0 : i32
    %148 = arith.cmpi eq, %c16_i32_12, %c0_i32 : i32
    %c1_i32 = arith.constant 1 : i32
    %149 = arith.select %148, %c1_i32, %c16_i32_12 : i32
    %150 = vector.broadcast %149 : i32 to vector<1x256xi32>
    %151 = arith.remsi %143, %150 : vector<1x256xi32>
    %c0_i32_13 = arith.constant 0 : i32
    %152 = vector.broadcast %c0_i32_13 : i32 to vector<1x256xi32>
    %153 = arith.cmpi ne, %151, %152 : vector<1x256xi32>
    %c0_i32_14 = arith.constant 0 : i32
    %154 = vector.broadcast %c0_i32_14 : i32 to vector<1x256xi32>
    %155 = arith.cmpi slt, %151, %154 : vector<1x256xi32>
    %c0_i32_15 = arith.constant 0 : i32
    %156 = arith.cmpi slt, %149, %c0_i32_15 : i32
    %157 = vector.broadcast %156 : i1 to vector<1x256xi1>
    %158 = vector.broadcast %157 : vector<1x256xi1> to vector<1x256xi1>
    %159 = arith.xori %155, %158 : vector<1x256xi1>
    %160 = arith.andi %159, %153 : vector<1x256xi1>
    %161 = vector.broadcast %149 : i32 to vector<1x256xi32>
    %162 = arith.addi %151, %161 : vector<1x256xi32>
    %163 = arith.select %160, %162, %151 : vector<1x256xi1>, vector<1x256xi32>
    %c1_i32_16 = arith.constant 1 : i32
    %164 = vector.broadcast %c1_i32_16 : i32 to vector<1x256xi32>
    %165 = arith.cmpi sge, %163, %164 : vector<1x256xi32>
    %c14_i32 = arith.constant 14 : i32
    %166 = vector.broadcast %c14_i32 : i32 to vector<1x256xi32>
    %167 = arith.cmpi sle, %163, %166 : vector<1x256xi32>
    %168 = vector.extract_strided_slice %110 {offsets = [0, 239], sizes = [1, 17], strides = [1, 1]} : vector<1x256xf32> to vector<1x17xf32>
    %169 = vector.extract_strided_slice %110 {offsets = [0, 0], sizes = [1, 239], strides = [1, 1]} : vector<1x256xf32> to vector<1x239xf32>
    %170 = tpu.concatenate %168, %169 in 1 : vector<1x17xf32>, vector<1x239xf32> -> vector<1x256xf32>
    %171 = arith.andi %145, %165 : vector<1x256xi1>
    %cst = arith.constant 0.000000e+00 : f32
    %172 = vector.broadcast %cst : f32 to vector<1x256xf32>
    %173 = arith.select %171, %170, %172 : vector<1x256xi1>, vector<1x256xf32>
    %174 = vector.extract_strided_slice %114 {offsets = [0, 240], sizes = [1, 16], strides = [1, 1]} : vector<1x256xf32> to vector<1x16xf32>
    %175 = vector.extract_strided_slice %114 {offsets = [0, 0], sizes = [1, 240], strides = [1, 1]} : vector<1x256xf32> to vector<1x240xf32>
    %176 = tpu.concatenate %174, %175 in 1 : vector<1x16xf32>, vector<1x240xf32> -> vector<1x256xf32>
    %cst_17 = arith.constant 0.000000e+00 : f32
    %177 = vector.broadcast %cst_17 : f32 to vector<1x256xf32>
    %178 = arith.select %145, %176, %177 : vector<1x256xi1>, vector<1x256xf32>
    %179 = vector.extract_strided_slice %118 {offsets = [0, 241], sizes = [1, 15], strides = [1, 1]} : vector<1x256xf32> to vector<1x15xf32>
    %180 = vector.extract_strided_slice %118 {offsets = [0, 0], sizes = [1, 241], strides = [1, 1]} : vector<1x256xf32> to vector<1x241xf32>
    %181 = tpu.concatenate %179, %180 in 1 : vector<1x15xf32>, vector<1x241xf32> -> vector<1x256xf32>
    %182 = arith.andi %145, %167 : vector<1x256xi1>
    %cst_18 = arith.constant 0.000000e+00 : f32
    %183 = vector.broadcast %cst_18 : f32 to vector<1x256xf32>
    %184 = arith.select %182, %181, %183 : vector<1x256xi1>, vector<1x256xf32>
    %185 = vector.extract_strided_slice %122 {offsets = [0, 255], sizes = [1, 1], strides = [1, 1]} : vector<1x256xf32> to vector<1x1xf32>
    %186 = vector.extract_strided_slice %122 {offsets = [0, 0], sizes = [1, 255], strides = [1, 1]} : vector<1x256xf32> to vector<1x255xf32>
    %187 = tpu.concatenate %185, %186 in 1 : vector<1x1xf32>, vector<1x255xf32> -> vector<1x256xf32>
    %cst_19 = arith.constant 0.000000e+00 : f32
    %188 = vector.broadcast %cst_19 : f32 to vector<1x256xf32>
    %189 = arith.select %165, %187, %188 : vector<1x256xi1>, vector<1x256xf32>
    %190 = vector.extract_strided_slice %130 {offsets = [0, 1], sizes = [1, 255], strides = [1, 1]} : vector<1x256xf32> to vector<1x255xf32>
    %191 = vector.extract_strided_slice %130 {offsets = [0, 0], sizes = [1, 1], strides = [1, 1]} : vector<1x256xf32> to vector<1x1xf32>
    %192 = tpu.concatenate %190, %191 in 1 : vector<1x255xf32>, vector<1x1xf32> -> vector<1x256xf32>
    %cst_20 = arith.constant 0.000000e+00 : f32
    %193 = vector.broadcast %cst_20 : f32 to vector<1x256xf32>
    %194 = arith.select %167, %192, %193 : vector<1x256xi1>, vector<1x256xf32>
    %195 = vector.extract_strided_slice %134 {offsets = [0, 15], sizes = [1, 241], strides = [1, 1]} : vector<1x256xf32> to vector<1x241xf32>
    %196 = vector.extract_strided_slice %134 {offsets = [0, 0], sizes = [1, 15], strides = [1, 1]} : vector<1x256xf32> to vector<1x15xf32>
    %197 = tpu.concatenate %195, %196 in 1 : vector<1x241xf32>, vector<1x15xf32> -> vector<1x256xf32>
    %198 = arith.andi %147, %165 : vector<1x256xi1>
    %cst_21 = arith.constant 0.000000e+00 : f32
    %199 = vector.broadcast %cst_21 : f32 to vector<1x256xf32>
    %200 = arith.select %198, %197, %199 : vector<1x256xi1>, vector<1x256xf32>
    %201 = vector.extract_strided_slice %138 {offsets = [0, 16], sizes = [1, 240], strides = [1, 1]} : vector<1x256xf32> to vector<1x240xf32>
    %202 = vector.extract_strided_slice %138 {offsets = [0, 0], sizes = [1, 16], strides = [1, 1]} : vector<1x256xf32> to vector<1x16xf32>
    %203 = tpu.concatenate %201, %202 in 1 : vector<1x240xf32>, vector<1x16xf32> -> vector<1x256xf32>
    %cst_22 = arith.constant 0.000000e+00 : f32
    %204 = vector.broadcast %cst_22 : f32 to vector<1x256xf32>
    %205 = arith.select %147, %203, %204 : vector<1x256xi1>, vector<1x256xf32>
    %206 = vector.extract_strided_slice %142 {offsets = [0, 17], sizes = [1, 239], strides = [1, 1]} : vector<1x256xf32> to vector<1x239xf32>
    %207 = vector.extract_strided_slice %142 {offsets = [0, 0], sizes = [1, 17], strides = [1, 1]} : vector<1x256xf32> to vector<1x17xf32>
    %208 = tpu.concatenate %206, %207 in 1 : vector<1x239xf32>, vector<1x17xf32> -> vector<1x256xf32>
    %209 = arith.andi %147, %167 : vector<1x256xi1>
    %cst_23 = arith.constant 0.000000e+00 : f32
    %210 = vector.broadcast %cst_23 : f32 to vector<1x256xf32>
    %211 = arith.select %209, %208, %210 : vector<1x256xi1>, vector<1x256xf32>
    %212 = arith.addf %173, %178 : vector<1x256xf32>
    %213 = arith.addf %184, %189 : vector<1x256xf32>
    %214 = arith.addf %126, %194 : vector<1x256xf32>
    %215 = arith.addf %200, %205 : vector<1x256xf32>
    %216 = arith.addf %212, %213 : vector<1x256xf32>
    %217 = arith.addf %214, %215 : vector<1x256xf32>
    %218 = arith.addf %216, %217 : vector<1x256xf32>
    %219 = arith.addf %218, %211 : vector<1x256xf32>
    %c0_24 = arith.constant 0 : index
    %220 = memref.load %arg4[%c0_24] : memref<1xf32, #tpu.memory_space<smem>>
    %221 = vector.broadcast %220 : f32 to vector<1x256xf32>
    %222 = arith.addf %219, %221 : vector<1x256xf32>
    %223 = arith.negf %222 : vector<1x256xf32>
    %224 = math.exp %223 : vector<1x256xf32>
    %cst_25 = arith.constant 1.000000e+00 : f32
    %225 = vector.broadcast %cst_25 : f32 to vector<1x256xf32>
    %226 = arith.addf %225, %224 : vector<1x256xf32>
    %227 = arith.divf %225, %226 : vector<1x256xf32>
    %228 = vector.extract_strided_slice %227 {offsets = [0, 240], sizes = [1, 16], strides = [1, 1]} : vector<1x256xf32> to vector<1x16xf32>
    %229 = vector.extract_strided_slice %227 {offsets = [0, 0], sizes = [1, 240], strides = [1, 1]} : vector<1x256xf32> to vector<1x240xf32>
    %230 = tpu.concatenate %228, %229 in 1 : vector<1x16xf32>, vector<1x240xf32> -> vector<1x256xf32>
    %231 = arith.select %145, %230, %227 : vector<1x256xi1>, vector<1x256xf32>
    %232 = vector.extract_strided_slice %227 {offsets = [0, 16], sizes = [1, 240], strides = [1, 1]} : vector<1x256xf32> to vector<1x240xf32>
    %233 = vector.extract_strided_slice %227 {offsets = [0, 0], sizes = [1, 16], strides = [1, 1]} : vector<1x256xf32> to vector<1x16xf32>
    %234 = tpu.concatenate %232, %233 in 1 : vector<1x240xf32>, vector<1x16xf32> -> vector<1x256xf32>
    %235 = arith.select %147, %234, %227 : vector<1x256xi1>, vector<1x256xf32>
    %cst_26 = arith.constant 2.500000e-01 : f32
    %236 = vector.broadcast %cst_26 : f32 to vector<1x256xf32>
    %237 = arith.mulf %236, %231 : vector<1x256xf32>
    %cst_27 = arith.constant 7.500000e-01 : f32
    %238 = vector.broadcast %cst_27 : f32 to vector<1x256xf32>
    %239 = arith.mulf %238, %227 : vector<1x256xf32>
    %240 = arith.addf %237, %239 : vector<1x256xf32>
    %cst_28 = arith.constant 7.500000e-01 : f32
    %241 = vector.broadcast %cst_28 : f32 to vector<1x256xf32>
    %242 = arith.mulf %241, %227 : vector<1x256xf32>
    %cst_29 = arith.constant 2.500000e-01 : f32
    %243 = vector.broadcast %cst_29 : f32 to vector<1x256xf32>
    %244 = arith.mulf %243, %235 : vector<1x256xf32>
    %245 = arith.addf %242, %244 : vector<1x256xf32>
    %246 = vector.extract_strided_slice %240 {offsets = [0, 255], sizes = [1, 1], strides = [1, 1]} : vector<1x256xf32> to vector<1x1xf32>
    %247 = vector.extract_strided_slice %240 {offsets = [0, 0], sizes = [1, 255], strides = [1, 1]} : vector<1x256xf32> to vector<1x255xf32>
    %248 = tpu.concatenate %246, %247 in 1 : vector<1x1xf32>, vector<1x255xf32> -> vector<1x256xf32>
    %249 = arith.select %165, %248, %240 : vector<1x256xi1>, vector<1x256xf32>
    %250 = vector.extract_strided_slice %240 {offsets = [0, 1], sizes = [1, 255], strides = [1, 1]} : vector<1x256xf32> to vector<1x255xf32>
    %251 = vector.extract_strided_slice %240 {offsets = [0, 0], sizes = [1, 1], strides = [1, 1]} : vector<1x256xf32> to vector<1x1xf32>
    %252 = tpu.concatenate %250, %251 in 1 : vector<1x255xf32>, vector<1x1xf32> -> vector<1x256xf32>
    %253 = arith.select %167, %252, %240 : vector<1x256xi1>, vector<1x256xf32>
    %cst_30 = arith.constant 2.500000e-01 : f32
    %254 = vector.broadcast %cst_30 : f32 to vector<1x256xf32>
    %255 = arith.mulf %254, %249 : vector<1x256xf32>
    %cst_31 = arith.constant 7.500000e-01 : f32
    %256 = vector.broadcast %cst_31 : f32 to vector<1x256xf32>
    %257 = arith.mulf %256, %240 : vector<1x256xf32>
    %258 = arith.addf %255, %257 : vector<1x256xf32>
    %c0_32 = arith.constant 0 : index
    %c0_33 = arith.constant 0 : index
    %c0_34 = arith.constant 0 : index
    %259 = vector.load %arg5[%c0_32, %c0_33, %c0_34] : memref<1x4x256xf32, #tpu.memory_space<vmem>>, vector<1x1x256xf32>
    %260 = vector.shape_cast %259 : vector<1x1x256xf32> to vector<1x256xf32>
    %261 = vector.shape_cast %258 : vector<1x256xf32> to vector<1x1x256xf32>
    tpu.vector_store %arg5[%c0_32, %c0_33, %c0_34], %261 {strides = array<i32>} : memref<1x4x256xf32, #tpu.memory_space<vmem>>, vector<1x1x256xf32>,
    %cst_35 = arith.constant 7.500000e-01 : f32
    %262 = vector.broadcast %cst_35 : f32 to vector<1x256xf32>
    %263 = arith.mulf %262, %240 : vector<1x256xf32>
    %cst_36 = arith.constant 2.500000e-01 : f32
    %264 = vector.broadcast %cst_36 : f32 to vector<1x256xf32>
    %265 = arith.mulf %264, %253 : vector<1x256xf32>
    %266 = arith.addf %263, %265 : vector<1x256xf32>
    %c0_37 = arith.constant 0 : index
    %c1_38 = arith.constant 1 : index
    %c0_39 = arith.constant 0 : index
    %267 = vector.load %arg5[%c0_37, %c1_38, %c0_39] : memref<1x4x256xf32, #tpu.memory_space<vmem>>, vector<1x1x256xf32>
    %268 = vector.shape_cast %267 : vector<1x1x256xf32> to vector<1x256xf32>
    %269 = vector.shape_cast %266 : vector<1x256xf32> to vector<1x1x256xf32>
    tpu.vector_store %arg5[%c0_37, %c1_38, %c0_39], %269 {strides = array<i32>} : memref<1x4x256xf32, #tpu.memory_space<vmem>>, vector<1x1x256xf32>,
    %270 = vector.extract_strided_slice %245 {offsets = [0, 255], sizes = [1, 1], strides = [1, 1]} : vector<1x256xf32> to vector<1x1xf32>
    %271 = vector.extract_strided_slice %245 {offsets = [0, 0], sizes = [1, 255], strides = [1, 1]} : vector<1x256xf32> to vector<1x255xf32>
    %272 = tpu.concatenate %270, %271 in 1 : vector<1x1xf32>, vector<1x255xf32> -> vector<1x256xf32>
    %273 = arith.select %165, %272, %245 : vector<1x256xi1>, vector<1x256xf32>
    %274 = vector.extract_strided_slice %245 {offsets = [0, 1], sizes = [1, 255], strides = [1, 1]} : vector<1x256xf32> to vector<1x255xf32>
    %275 = vector.extract_strided_slice %245 {offsets = [0, 0], sizes = [1, 1], strides = [1, 1]} : vector<1x256xf32> to vector<1x1xf32>
    %276 = tpu.concatenate %274, %275 in 1 : vector<1x255xf32>, vector<1x1xf32> -> vector<1x256xf32>
    %277 = arith.select %167, %276, %245 : vector<1x256xi1>, vector<1x256xf32>
    %cst_40 = arith.constant 2.500000e-01 : f32
    %278 = vector.broadcast %cst_40 : f32 to vector<1x256xf32>
    %279 = arith.mulf %278, %273 : vector<1x256xf32>
    %cst_41 = arith.constant 7.500000e-01 : f32
    %280 = vector.broadcast %cst_41 : f32 to vector<1x256xf32>
    %281 = arith.mulf %280, %245 : vector<1x256xf32>
    %282 = arith.addf %279, %281 : vector<1x256xf32>
    %c0_42 = arith.constant 0 : index
    %c2_43 = arith.constant 2 : index
    %c0_44 = arith.constant 0 : index
    %283 = vector.load %arg5[%c0_42, %c2_43, %c0_44] : memref<1x4x256xf32, #tpu.memory_space<vmem>>, vector<1x1x256xf32>
    %284 = vector.shape_cast %283 : vector<1x1x256xf32> to vector<1x256xf32>
    %285 = vector.shape_cast %282 : vector<1x256xf32> to vector<1x1x256xf32>
    tpu.vector_store %arg5[%c0_42, %c2_43, %c0_44], %285 {strides = array<i32>} : memref<1x4x256xf32, #tpu.memory_space<vmem>>, vector<1x1x256xf32>,
    %cst_45 = arith.constant 7.500000e-01 : f32
    %286 = vector.broadcast %cst_45 : f32 to vector<1x256xf32>
    %287 = arith.mulf %286, %245 : vector<1x256xf32>
    %cst_46 = arith.constant 2.500000e-01 : f32
    %288 = vector.broadcast %cst_46 : f32 to vector<1x256xf32>
    %289 = arith.mulf %288, %277 : vector<1x256xf32>
    %290 = arith.addf %287, %289 : vector<1x256xf32>
    %c0_47 = arith.constant 0 : index
    %c3_48 = arith.constant 3 : index
    %c0_49 = arith.constant 0 : index
    %291 = vector.load %arg5[%c0_47, %c3_48, %c0_49] : memref<1x4x256xf32, #tpu.memory_space<vmem>>, vector<1x1x256xf32>
    %292 = vector.shape_cast %291 : vector<1x1x256xf32> to vector<1x256xf32>
    %293 = vector.shape_cast %290 : vector<1x256xf32> to vector<1x1x256xf32>
    tpu.vector_store %arg5[%c0_47, %c3_48, %c0_49], %293 {strides = array<i32>} : memref<1x4x256xf32, #tpu.memory_space<vmem>>, vector<1x1x256xf32>,
    return
  }
  func.func @transform_0(%arg0: i32, %arg1: i32) -> (i32, i32, i32) {
    %c0_i32 = arith.constant 0 : i32
    %c0_i32_0 = arith.constant 0 : i32
    return %arg0, %arg1, %c0_i32 : i32, i32, i32
  }
  func.func @transform_1(%arg0: i32, %arg1: i32) -> i32 {
    %c0_i32 = arith.constant 0 : i32
    %c0_i32_0 = arith.constant 0 : i32
    return %c0_i32 : i32
  }
  func.func @transform_2(%arg0: i32, %arg1: i32) -> i32 {
    %c0_i32 = arith.constant 0 : i32
    %c0_i32_0 = arith.constant 0 : i32
    return %c0_i32 : i32
  }
  func.func @transform_3(%arg0: i32, %arg1: i32) -> (i32, i32, i32) {
    %c0_i32 = arith.constant 0 : i32
    %c0_i32_0 = arith.constant 0 : i32
    %c0_i32_1 = arith.constant 0 : i32
    return %arg0, %c0_i32, %c0_i32_0 : i32, i32, i32
  }
}

</mosaic_0001>

<bundles_post_ra>
// kernel: tpu_custom_call.1
= control target key start
LH: loop header
LB: loop body
LE: loop exit
PB: predicated region body
PF: predicated region fallthrough
CT: control target
= control target key end

     0   :  { %s1542_s0 = inlined_call_operand.hbm [shape: f32[2,4,256], index: 0, kind: input, shape index: {}]   ;;  %s1543_s1 = inlined_call_operand.vmem [shape: f32[36], index: 1, kind: input, shape index: {}]   ;;  %s1544_s2 = inlined_call_operand.<no memory space> [shape: f32[1], index: 2, kind: input, shape index: {}]   ;;  %s1545_s3 = inlined_call_operand.hbm [shape: f32[2,4,256], index: 3, kind: output, shape index: {}]  }
   0x1   :  { %8 = sst [smem:[#allocation3]] %s1544_s2 }
   0x2   :  { %9 = vsyncpa [#allocation5], 0 }
   0x3   :  { %11 = vsyncpa [#allocation5 + $0x1], 0 }
   0x4   :  { %12 = vsyncpa [#allocation7], 0 }
   0x5   :  { %13 = vsyncpa [#allocation6], 0 }
   0x6   :  { %15 = vsyncpa [#allocation6 + $0x1], 0  ;;  %s1153_s14 = smov 0   ;;  %s1155_s15 = smov 0  }
   0x7   :  { %s1157_s16 = smov 0   ;;  %s1159_s17 = smov 0  }
   0x8   :  { %s1161_s18 = smov 0   ;;  %s1163_s19 = smov 0  }
   0x9 LB: > { %s837_s2 = sadd.s32 4294967295, %s1119_s19   ;;  %s838_s20 = sadd.s32 4294967294, %s1119_s19   ;;  %s1119_s19 = sphi %s1163_s19, %s21_s19   ;;  %s1115_s18 = sphi %s1161_s18, %s1588_s18   ;;  %s1111_s17 = sphi %s1159_s17, %s1587_s17   ;;  %s1107_s16 = sphi %s1157_s16, %s1586_s16   ;;  %s1103_s15 = sphi %s1155_s15, %s1585_s15   ;;  %s1099_s14 = sphi %s1153_s14, %s1584_s14  }
   0xa   : > { %p55_p0 = scmp.ne.s32.totalorder %s1103_s15, %s1099_s14  ;;  %p1187_p1 = scmp.eq.s32.totalorder %s837_s2, 0 }
   0xb   : > { %p1191_p2 = scmp.eq.s32.totalorder %s837_s2, 1  ;;  %p127_p3 = scmp.eq.s32.totalorder %s838_s20, 1 }
   0xc   : > { %p1197_p4 = por %p1187_p1, %p55_p0  ;;  %p839_p5 = scmp.ge.s32.totalorder %s1119_s19, 1 }
   0xd   : > { %p1202_p6 = por %p127_p3, %p55_p0  ;;  %p134_p7 = scmp.lt.s32.totalorder %s1119_s19, 3 }
   0xe   : > { %s146_s27 = sshll.u32 %s1543_s1, 4  ;;  %s33_s29 = sadd.s32 1, %s1115_s18  ;;  %s147_s27 = int_to_ptr.vmem [resolvable:$true] %s146_s27 }
   0xf   : > { %p1210_p8 = pnand %p839_p5, %p134_p7  ;;  %s42_s30 = sadd.s32 1, %s1107_s16 }
  0x10   : > { %p35_p12 = scmp.ge.s32.totalorder %s33_s29, 2  ;;  %s1121_s4 = smov [#allocation8]  }
  0x11   : > { %p907_p10 = pneg %p1210_p8  ;;  %p49_p13 = scmp.ne.s32.totalorder %s1107_s16, %s1103_s15 }
  0x12   : > { %s1590_s29 = smov (%p35_p12, %s33_s29), 0  ;;  %p50_p0 = scmp.eq.s32.totalorder %s1119_s19, 0 }
  0x13   : > { %p908_p11 = pnand %p907_p10, %p1187_p1  ;;  %s37_s5 = ssub.s32 %s1115_s18, %s1590_s29 }
  0x14   : > { %p920_p3 = scmp.lt.s32.totalorder %s1119_s19, 2  ;;  %p40_p5 = scmp.eq.s32.totalorder %s37_s5, 0 }
  0x15   : > { %910 = dma.vmem_to_smem (!%p908_p11), %s147_s27, 16, %s1121_s4, [#allocation7]  }
  0x16   : > { %p51_p7 = por %p50_p0, %p49_p13  ;;  %p1231_p9 = por %p1191_p2, %p49_p13 }
  0x17   : > { %s160_s7 = sand.u32 1, %s1107_s16   ;;  %s897_s10 = sshll.u32 %s1115_s18, 3 }
  0x18   : > { %s1237_s8 = scalar_select %p40_p5, %s1107_s16, %s42_s30  }
  0x19   : > { %s842_s9 = sshll.u32 %s160_s7, 3  ;;  %s171_s13 = scalar_lea.hbm %s1542_s0, %s897_s10 }
  0x1a   : > { %s164_s2 = scalar_lea.vmem [#allocation4], %s842_s9  ;;  %s173_s25 = sshll.u32 %s171_s13, 4  ;;  %s174_s25 = int_to_ptr.hbm [resolvable:$true] %s173_s25 }
  0x1b   : > { %s175_s20 = sshll.u32 %s164_s2, 4  ;;  %p912_p10 = pnand %p920_p3, %p51_p7  ;;  %s176_s20 = int_to_ptr.vmem [resolvable:$true] %s175_s20 }
  0x1c   : > { %s161_s22 = scalar_lea.sflag [#allocation5], %s160_s7  ;;  %184 = sbr.rel (%p1210_p8) target bundleno = 514 (0x202), region = 32 }
  0x1d   : > { %914 = dma.hbm_to_vmem [thread:$0]  (!%p912_p10), %s174_s25, 128, %s176_s20, %s161_s22  }
  0x1e   : > { %s1248_s26 = sand.u32 (!%p1210_p8), 1, %s1103_s15  }
  0x1f   : > { %s846_s27 = sshll.u32 (!%p1210_p8), %s1248_s26, 3  ;;  %s187_s30 = scalar_lea.sflag (!%p1210_p8), [#allocation5], %s1248_s26 }
  0x20   : > { %s190_s4 = scalar_lea.vmem (!%p1210_p8), [#allocation4], %s846_s27 }
  0x21   : > { %1086 = dma.done.wait (%p1197_p4), %s187_s30, 128  }
  0x22   : > { %1088 = vsyncadd (%p1197_p4), %s187_s30, 4294967168 }
  0x23   : > { %1090 = dma.done.wait (%p1187_p1), [#allocation7], 16  }
  0x24   : > { %1092 = vsyncadd (%p1187_p1), [#allocation7], 4294967280 }
  0x25   : > { %201 = sfence }
  0x26   : > { %s854_s28 = sld [smem:[#allocation8 + $0x6]]  ;;  %v1262_v0 = vld [vmem:[%s190_s4] ss:$4 sm:$0x3]  ;;  %vm500_vm1 = vcmask 916480   ;;  %vm483_vm2 = vcmask 924672  }
  0x27   : > { %s864_s5 = sld [smem:[#allocation8 + $0xf]]  ;;  %v1264_v1 = vld [vmem:[%s190_s4 + $0x1] ss:$4 sm:$0x3]  ;;  %vm1548_vm4 = vcmask 1039360   ;;  %vm1546_vm9 = vcmask 1040384  }
  0x28   : > { %s874_s7 = sld [smem:[#allocation8 + $0x18]]  ;;  %v1266_v3 = vld [vmem:[%s190_s4 + $0x2] ss:$4 sm:$0x3]  ;;  %vm422_vm10 = vcmask 130048   ;;  %vm405_vm12 = vcmask 138240  }
  0x29   : > { %s884_s9 = sld [smem:[#allocation8 + $0x21]]  ;;  %v1269_v6 = vld [vmem:[%s190_s4 + $0x3] ss:$4 sm:$0x3]  ;;  %vm437_vm13 = vcmask 121856   ;;  %vm1547_vm15 = vcmask 7168  }
  0x2a   : > { %s853_s10 = sld [smem:[#allocation8 + $0x5]] }
  0x2b   : > { %s863_s11 = sld [smem:[#allocation8 + $0xe]] }
  0x2c   : > { %v240_v2 = vstv %s854_s28  ;;  %s873_s23 = sld [smem:[#allocation8 + $0x17]] }
  0x2d   : > { %v241_v4 = vmul.f32 %v240_v2, %v1262_v0  ;;  %v275_v5 = vstv %s864_s5  ;;  %s883_s21 = sld [smem:[#allocation8 + $0x20]] }
  0x2e   : > { %v276_v7 = vmul.f32 %v1264_v1, %v275_v5  ;;  %v313_v8 = vstv %s874_s7  ;;  %s221_s12 = sld [smem:[#allocation8]]  ;;  %s1122_s7 = smov 113  }
  0x2f   : > { %v314_v9 = vmul.f32 %v1266_v3, %v313_v8  ;;  %v351_v10 = vstv %s884_s9  ;;  %s858_s13 = sld [smem:[#allocation8 + $0x9]] }
  0x30   : > { %v277_v11 = vadd.f32 %v276_v7, %v241_v4  ;;  %v352_v12 = vmul.f32 %v1269_v6, %v351_v10  ;;  %v237_v13 = vstv %s853_s10  ;;  %s868_s2 = sld [smem:[#allocation8 + $0x12]] }
  0x31   : > { %v238_v14 = vmul.f32 %v237_v13, %v1262_v0  ;;  %v271_v15 = vstv %s863_s11  ;;  %s1275_s20 = sld [smem:[#allocation8 + $0x1b]] }
  0x32   : > { %v315_v16 = vadd.f32 %v314_v9, %v277_v11  ;;  %v272_v17 = vmul.f32 %v1264_v1, %v271_v15  ;;  %v309_v18 = vstv %s873_s23  ;;  %s855_s25 = sld [smem:[#allocation8 + $0x7]] }
  0x33   : > { %v310_v19 = vmul.f32 %v1266_v3, %v309_v18  ;;  %v347_v20 = vstv %s883_s21  ;;  %s865_s22 = sld [smem:[#allocation8 + $0x10]]  ;;  %s1123_s21 = smov 127  }
  0x34   : > { %v353_v21 = vadd.f32 %v352_v12, %v315_v16  ;;  %v273_v22 = vadd.f32 %v272_v17, %v238_v14  ;;  %v348_v23 = vmul.f32 %v1269_v6, %v347_v20  ;;  %v222_v24 = vstv %s221_s12  ;;  %s1280_s30 = sld [smem:[#allocation8 + $0x19]] }
  0x35   : > { %v223_v25 = vmul.f32 %v222_v24, %v1262_v0  ;;  %v251_v26 = vstv %s858_s13  ;;  %s1283_s4 = sld [smem:[#allocation8 + $0x22]] }
  0x36   : > { %v477_v27 = vperm.slane %v353_v21, 0  ;;  %v311_v28 = vadd.f32 %v310_v19, %v273_v22  ;;  %v252_v29 = vmul.f32 %v1264_v1, %v251_v26  ;;  %s850_s28 = sld [smem:[#allocation8 + $0x2]]  ;;  %v289_v30 = vstv %s868_s2 }
  0x37   : > { %s1286_s5 = sld [smem:[#allocation8 + $0xb]]  ;;  %v290_v33 = vmul.f32 %v1266_v3, %v289_v30  ;;  %v327_v34 = vstv %s1275_s20  ;;  %v478_v39 = vperm.slane %v353_v21, 1 }
  0x38   : > { %479 = vrot.lane.b32.xlu1 %v477_v27, %s1122_s7  ;;  %v349_v31 = vadd.f32 %v348_v23, %v311_v28  ;;  %v253_v32 = vadd.f32 %v252_v29, %v223_v25  ;;  %s870_s9 = sld [smem:[#allocation8 + $0x14]]  ;;  %v243_v35 = vstv %s855_s25  ;;  %v328_v44 = vmul.f32 %v1269_v6, %v327_v34 }
  0x39   : > { %v279_v36 = vstv %s865_s22  ;;  %s1291_s10 = sld [smem:[#allocation8 + $0x1d]]  ;;  %v244_v38 = vmul.f32 %v243_v35, %v1262_v0 }
  0x3a   : > { %v462_v37 = vperm.slane %v349_v31, 0  ;;  %s1294_s11 = sld [smem:[#allocation8 + $0x1]]  ;;  %v280_v40 = vmul.f32 %v1264_v1, %v279_v36  ;;  %v317_v41 = vstv %s1280_s30  ;;  %v291_v43 = vadd.f32 %v290_v33, %v253_v32 }
  0x3b   : > { %v355_v42 = vstv %s1283_s4  ;;  %s859_s23 = sld [smem:[#allocation8 + $0xa]]  ;;  %v318_v45 = vmul.f32 %v1266_v3, %v317_v41  ;;  %v463_v53 = vperm.slane %v349_v31, 1  ;;  %s1124_s4 = smov 112  }
  0x3c   : > { %464 = vrot.lane.b32.xlu0 %v462_v37, %s1123_s21  ;;  %v228_v46 = vstv %s850_s28  ;;  %s1302_s12 = sld [smem:[#allocation8 + $0x13]]  ;;  %v281_v47 = vadd.f32 %v280_v40, %v244_v38  ;;  %v356_v48 = vmul.f32 %v1269_v6, %v355_v42  ;;  %v329_v56 = vadd.f32 %v328_v44, %v291_v43 }
  0x3d   : > { %v229_v49 = vmul.f32 %v228_v46, %v1262_v0  ;;  %v259_v50 = vstv %s1286_s5  ;;  %s1307_s13 = sld [smem:[#allocation8 + $0x1c]]  ;;  %s1125_s5 = smov 17  }
  0x3e   : > { %v260_v51 = vmul.f32 %v1264_v1, %v259_v50  ;;  %v297_v52 = vstv %s870_s9  ;;  %s851_s2 = sld [smem:[#allocation8 + $0x3]]  ;;  %v319_v54 = vadd.f32 %v318_v45, %v281_v47  ;;  %v402_v8 = vperm.slane %v329_v56, 0 }
  0x3f   : > { %v298_v55 = vmul.f32 %v1266_v3, %v297_v52  ;;  %s861_s20 = sld [smem:[#allocation8 + $0xc]]  ;;  %v335_v58 = vstv %s1291_s10  ;;  %v398_v17 = vperm.slane %v329_v56, 1  ;;  %s1126_s10 = smov 15  }
  0x40   : > { %481 = vrot.lane.b32.xlu1 %v478_v39, %s1122_s7  ;;  %v261_v57 = vadd.f32 %v260_v51, %v229_v49  ;;  %v225_v59 = vstv %s1294_s11  ;;  %s1314_s25 = sld [smem:[#allocation8 + $0x15]]  ;;  %v357_v60 = vadd.f32 %v356_v48, %v319_v54  ;;  %v336_v7 = vmul.f32 %v1269_v6, %v335_v58  ;;  %s1127_s11 = smov 16  }
  0x41   : > { %v226_v61 = vmul.f32 %v225_v59, %v1262_v0  ;;  %v255_v62 = vstv %s859_s23  ;;  %s1317_s22 = sld [smem:[#allocation8 + $0x1e]]  ;;  %s1128_s23 = smov 1   ;;  %v362_v49 = vlaneseq }
  0x42   : > { %v256_v63 = vmul.f32 %v1264_v1, %v255_v62  ;;  %v293_v2 = vstv %s1302_s12  ;;  %v494_v4 = vperm.slane %v357_v60, 0  ;;  %v299_v5 = vadd.f32 %v298_v55, %v261_v57  ;;  %s1324_s30 = sld [smem:[#allocation8 + $0x8]]  ;;  %s1129_s12 = smov 111  }
  0x43   : > { %v294_v10 = vmul.f32 %v1266_v3, %v293_v2  ;;  %v331_v12 = vstv %s1307_s13  ;;  %s866_s28 = sld [smem:[#allocation8 + $0x11]]  ;;  %v495_v23 = vperm.slane %v357_v60, 1  ;;  %v1346_v52 = vand.u32 127, %v362_v49 }
  0x44   : > { %466 = vrot.lane.b32.xlu0 %v463_v53, %s1123_s21  ;;  %v257_v9 = vadd.f32 %v256_v63, %v226_v61  ;;  %v231_v11 = vstv %s851_s2  ;;  %496 = vrot.lane.b32.xlu2 %v494_v4, %s1124_s4  ;;  %v337_v18 = vadd.f32 %v336_v7, %v299_v5  ;;  %v332_v20 = vmul.f32 %v1269_v6, %v331_v12  ;;  %s876_s7 = sld [smem:[#allocation8 + $0x1a]] }
  0x45   : > { %v232_v13 = vmul.f32 %v231_v11, %v1262_v0  ;;  %v263_v14 = vstv %s861_s20  ;;  %s886_s9 = sld [smem:[#allocation8 + $0x23]]  ;;  %v1349_v53 = vadd.s32 128, %v1346_v52  ;;  %vm365_vm11 = vcmp.ge.s32.totalorder %v1346_v52, 16 }
  0x46   : > { %v264_v15 = vmul.f32 %v1264_v1, %v263_v14  ;;  %v301_v16 = vstv %s1314_s25  ;;  %v295_v19 = vadd.f32 %v294_v10, %v257_v9  ;;  %v430_v25 = vperm.slane %v337_v18, 1  ;;  %s852_s13 = sld [smem:[#allocation8 + $0x4]] }
  0x47   : > { %v302_v22 = vmul.f32 %v1266_v3, %v301_v16  ;;  %v339_v24 = vstv %s1317_s22  ;;  %v434_v44 = vperm.slane %v337_v18, 0  ;;  %s862_s2 = sld [smem:[#allocation8 + $0xd]]  ;;  %v380_v55 = vand.u32 15, %v1349_v53 }
  0x48   : > { %403 = vrot.lane.b32.xlu1 %v402_v8, %s1125_s5  ;;  %v265_v21 = vadd.f32 %v264_v15, %v232_v13  ;;  %v333_v26 = vadd.f32 %v332_v20, %v295_v19  ;;  %v340_v28 = vmul.f32 %v1269_v6, %v339_v24  ;;  %v246_v29 = vstv %s1324_s30  ;;  %s872_s20 = sld [smem:[#allocation8 + $0x16]]  ;;  %s898_s30 = sshll.u32 %s1111_s17, 3 }
  0x49   : > { %v283_v30 = vstv %s866_s28  ;;  %v247_v33 = vmul.f32 %v246_v29, %v1262_v0  ;;  %s882_s25 = sld [smem:[#allocation8 + $0x1f]]  ;;  %vm368_vm0 = vcmp.lt.s32.totalorder %v1349_v53, 240  ;;  %vm1353_vm3 = vcmp.ge.s32.totalorder %v380_v55, 1 }
  0x4a   : > { %v303_v27 = vadd.f32 %v302_v22, %v265_v21  ;;  %v419_v31 = vperm.slane %v333_v26, 0  ;;  %v284_v34 = vmul.f32 %v1264_v1, %v283_v30  ;;  %v321_v35 = vstv %s876_s7  ;;  %vm1364_vm5 = vmand %vm368_vm0, %vm1353_vm3  ;;  %s555_s22 = sld [smem:[#allocation3]]  ;;  %s731_s7 = scalar_lea.sflag [#allocation6], %s1248_s26 }
  0x4b   : > { %v415_v36 = vperm.slane %v333_v26, 1  ;;  %v322_v39 = vmul.f32 %v1266_v3, %v321_v35  ;;  %v359_v40 = vstv %s886_s9  ;;  %vm1369_vm6 = vcmp.le.s32.totalorder %v380_v55, 14 }
  0x4c   : > { %399 = vrot.lane.b32.xlu0 %v398_v17, %s1125_s5  ;;  %498 = vrot.lane.b32.xlu2 %v495_v23, %s1124_s4  ;;  %v341_v32 = vadd.f32 %v340_v28, %v303_v27  ;;  %v285_v38 = vadd.f32 %v284_v34, %v247_v33  ;;  %v360_v43 = vmul.f32 %v1269_v6, %v359_v40  ;;  %v234_v57 = vstv %s852_s13 }
  0x4d   : > { %v267_v58 = vstv %s862_s2  ;;  %v235_v62 = vmul.f32 %v234_v57, %v1262_v0 }
  0x4e   : > { %v451_v37 = vperm.slane %v341_v32, 0  ;;  %v447_v41 = vperm.slane %v341_v32, 1  ;;  %v323_v42 = vadd.f32 %v322_v39, %v285_v38  ;;  %v268_v61 = vmul.f32 %v1264_v1, %v267_v58 }
  0x4f   : > { %v305_v2 = vstv %s872_s20  ;;  %v373_v1 = vand.u32 15, %v1346_v52  ;;  %v343_v12 = vstv %s882_s25 }
  0x50   : > { %431 = vrot.lane.b32.xlu1 %v430_v25, %s1126_s10  ;;  %v361_v45 = vadd.f32 %v360_v43, %v323_v42  ;;  %v306_v9 = vmul.f32 %v1266_v3, %v305_v2  ;;  %v269_v10 = vadd.f32 %v268_v61, %v235_v62  ;;  %v344_v18 = vmul.f32 %v1269_v6, %v343_v12 }
  0x51   : > { %vm1382_vm7 = vcmp.ge.s32.totalorder %v373_v1, 1  ;;  %vm1387_vm8 = vcmp.le.s32.totalorder %v373_v1, 14  ;;  %v556_v12 = vstv %s555_s22 }
  0x52   : > { %v510_v46 = vperm.slane %v361_v45, 1  ;;  %v509_v47 = vperm.slane %v361_v45, 0  ;;  %v307_v19 = vadd.f32 %v306_v9, %v269_v10  ;;  %vm1406_vm14 = vmand %vm365_vm11, %vm1382_vm7 }
  0x54   : > { %420 = vrot.lane.b32.xlu0 %v419_v31, %s1127_s11  ;;  %416 = vrot.lane.b32.xlu2 %v415_v36, %s1127_s11  ;;  %v345_v27 = vadd.f32 %v344_v18, %v307_v19 }
  0x58   : > { %452 = vrot.lane.b32.xlu1 %v451_v37, %s1128_s23 }
  0x5c   : > { %448 = vrot.lane.b32.xlu0 %v447_v41, %s1128_s23  ;;  %435 = vrot.lane.b32.xlu2 %v434_v44, %s1126_s10 }
  0x64   : > { %513 = vrot.lane.b32.xlu0 %v510_v46, %s1129_s12  ;;  %511 = vrot.lane.b32.xlu2 %v509_v47, %s1129_s12  ;;  %s1053_s12 = scalar_lea.hbm %s1545_s3, 16 }
  0x9e   : > { %v497_v50 = vpop.permute.xlu2 %496 }
  0xa6   : > { %v499_v59 = vpop.permute.xlu2 %498 }
  0xa7   : > { %v505_v4 = vsel %vm500_vm1, %v499_v59, %v497_v50  ;;  %v501_v25 = vsel %vm500_vm1, %v497_v50, %v499_v59 }
  0xa8   : > { %v507_v13 = vsel %vm368_vm0, %v505_v4, 0.0 }
  0xaa   : > { %v480_v48 = vpop.permute.xlu1 %479 }
  0xae   : > { %v465_v51 = vpop.permute.xlu0 %464  ;;  %v417_v16 = vpop.permute.xlu2 %416 }
  0xb2   : > { %v482_v54 = vpop.permute.xlu1 %481 }
  0xb3   : > { %v488_v7 = vsel %vm483_vm2, %v482_v54, %v480_v48  ;;  %v484_v21 = vsel %vm483_vm2, %v480_v48, %v482_v54  ;;  %vm1414_vm2 = vmand %vm365_vm11, %vm1387_vm8 }
  0xb4   : > { %v492_v14 = vsel %vm1364_vm5, %v488_v7, 0.0  ;;  %v491_v26 = vsel %vm1382_vm7, %v484_v21, 0.0  ;;  %vm515_vm5 = vcmask 908288  }
  0xb5   : > { %v537_v22 = vadd.f32 %v507_v13, %v492_v14  ;;  %v536_v31 = vadd.f32 %v501_v25, %v491_v26 }
  0xb6   : > { %v467_v56 = vpop.permute.xlu0 %466  ;;  %v436_v33 = vpop.permute.xlu2 %435 }
  0xb7   : > { %v473_v0 = vsel %vm1548_vm4, %v467_v56, %v465_v51  ;;  %v469_v23 = vsel %vm1548_vm4, %v465_v51, %v467_v56  ;;  %v542_v29 = vrot.slane %v537_v22, 7 }
  0xb8   : > { %v475_v15 = vsel %vm1369_vm6, %v473_v0, 0.0  ;;  %v474_v6 = vsel %vm1387_vm8, %v469_v23, 0.0 }
  0xb9   : > { %v531_v24 = vrot.slane %v475_v15, 7  ;;  %v543_v34 = vsel %vm1546_vm9, %v536_v31, %v542_v29 }
  0xba   : > { %v404_v63 = vpop.permute.xlu1 %403 }
  0xbb   : > { %v533_v30 = vsel %vm1546_vm9, %v474_v6, %v531_v24 }
  0xbc   : > { %v535_v32 = vadd.f32 %v533_v30, %v345_v27 }
  0xbe   : > { %v400_v11 = vpop.permute.xlu0 %399  ;;  %v545_v43 = vadd.f32 %v543_v34, %v535_v32  ;;  %v512_v4 = vpop.permute.xlu2 %511 }
  0xbf   : > { %v406_v37 = vsel %vm405_vm12, %v404_v63, %v400_v11  ;;  %v409_v38 = vsel %vm405_vm12, %v400_v11, %v404_v63  ;;  %vm522_vm12 = vmand %vm368_vm0, %vm1369_vm6 }
  0xc0   : > { %v412_v47 = vsel %vm1406_vm14, %v409_v38, 0.0  ;;  %v413_v48 = vsel %vm1353_vm3, %v406_v37, 0.0  ;;  %v547_v5 = vperm.slane %v545_v43, 0  ;;  %v548_v7 = vperm.slane %v545_v43, 1 }
  0xc2   : > { %v432_v20 = vpop.permute.xlu1 %431 }
  0xc3   : > { %v438_v41 = vsel %vm437_vm13, %v436_v33, %v432_v20  ;;  %v441_v42 = vsel %vm437_vm13, %v432_v20, %v436_v33 }
  0xc4   : > { %v444_v54 = vsel %vm1414_vm2, %v441_v42, 0.0  ;;  %v445_v55 = vsel %vm1369_vm6, %v438_v41, 0.0 }
  0xc6   : > { %v421_v28 = vpop.permute.xlu0 %420 }
  0xc7   : > { %v426_v35 = vsel %vm422_vm10, %v417_v16, %v421_v28  ;;  %v423_v44 = vsel %vm422_vm10, %v421_v28, %v417_v16 }
  0xc8   : > { %v427_v45 = vsel %vm365_vm11, %v426_v35, 0.0  ;;  %v526_v59 = vadd.f32 %v423_v44, %v413_v48 }
  0xc9   : > { %v525_v58 = vadd.f32 %v427_v45, %v412_v47 }
  0xca   : > { %v453_v39 = vpop.permute.xlu1 %452 }
  0xce   : > { %v449_v46 = vpop.permute.xlu0 %448 }
  0xcf   : > { %v455_v50 = vsel %vm1547_vm15, %v453_v39, %v449_v46  ;;  %v458_v51 = vsel %vm1547_vm15, %v449_v46, %v453_v39 }
  0xd0   : > { %v459_v56 = vsel %vm1382_vm7, %v458_v51, 0.0  ;;  %v460_v57 = vsel %vm1353_vm3, %v455_v50, 0.0 }
  0xd1   : > { %v527_v61 = vadd.f32 %v459_v56, %v444_v54  ;;  %v528_v62 = vadd.f32 %v460_v57, %v445_v55 }
  0xd3   : > { %v538_v63 = vadd.f32 %v527_v61, %v525_v58  ;;  %v539_v2 = vadd.f32 %v528_v62, %v526_v59 }
  0xd5   : > { %v551_v1 = vadd.f32 %v547_v5, %v538_v63  ;;  %v552_v9 = vadd.f32 %v548_v7, %v539_v2 }
  0xd6   : > { %v514_v0 = vpop.permute.xlu0 %513 }
  0xd7   : > { %v516_v10 = vsel %vm515_vm5, %v512_v4, %v514_v0  ;;  %v520_v11 = vsel %vm515_vm5, %v514_v0, %v512_v4 }
  0xd8   : > { %v523_v13 = vsel %vm1387_vm8, %v516_v10, 0.0  ;;  %v524_v14 = vsel %vm522_vm12, %v520_v11, 0.0 }
  0xd9   : > { %v553_v15 = vadd.f32 %v551_v1, %v523_v13  ;;  %v554_v16 = vadd.f32 %v552_v9, %v524_v14 }
  0xdb   : > { %v557_v18 = vadd.f32 %v556_v12, %v553_v15  ;;  %v558_v19 = vadd.f32 %v556_v12, %v554_v16 }
  0xdd   : > { %v887_v20 = vmul.f32 -1.442695, %v557_v18  ;;  %v888_v21 = vmul.f32 -1.442695, %v558_v19 }
  0xdf   : > { %980 = vpow2.f32 %v887_v20 }
  0xe0   : > { %982 = vpow2.f32 %v888_v21 }
  0xe5   : > { %v981_v22 = vpop.eup %980 }
  0xe6   : > { %v983_v23 = vpop.eup %982  ;;  %v565_v24 = vadd.f32 1.0, %v981_v22 }
  0xe7   : > { %v566_v25 = vadd.f32 1.0, %v983_v23 }
  0xe8   : > { %984 = vrcp.f32 %v565_v24  ;;  %v578_v31 = vand.u32 2147483648, %v565_v24  ;;  %v576_v34 = vand.u32 2147483647, %v565_v24  ;;  %vm572_vm2 = vweird.f32 %v565_v24 }
  0xe9   : > { %986 = vrcp.f32 %v566_v25  ;;  %v593_v32 = vand.u32 2147483648, %v566_v25  ;;  %v591_v36 = vand.u32 2147483647, %v566_v25  ;;  %vm587_vm5 = vweird.f32 %v566_v25 }
  0xea   : > { %v579_v39 = vor.u32 1.1754944e-38, %v578_v31  ;;  %vm577_vm15 = vcmp.eq.f32.partialorder %v576_v34, 8.507059e+37 }
  0xeb   : > { %v594_v40 = vor.u32 1.1754944e-38, %v593_v32  ;;  %vm592_vm4 = vcmp.eq.f32.partialorder %v591_v36, 8.507059e+37 }
  0xee   : > { %v985_v26 = vpop.eup %984 }
  0xef   : > { %v987_v27 = vpop.eup %986  ;;  %v568_v6 = vmul.f32 %v985_v26, %v565_v24  ;;  %vm573_vm13 = vweird.f32 %v985_v26 }
  0xf0   : > { %v583_v28 = vmul.f32 %v987_v27, %v566_v25  ;;  %vm588_vm14 = vweird.f32 %v987_v27  ;;  %vm574_vm12 = vmor %vm572_vm2, %vm573_vm13 }
  0xf1   : > { %v569_v29 = vsub.f32 1.0, %v568_v6  ;;  %vm589_vm9 = vmor %vm587_vm5, %vm588_vm14 }
  0xf2   : > { %v584_v30 = vsub.f32 1.0, %v583_v28 }
  0xf3   : > { %v570_v33 = vmul.f32 %v985_v26, %v569_v29 }
  0xf4   : > { %v585_v35 = vmul.f32 %v987_v27, %v584_v30 }
  0xf5   : > { %v571_v37 = vadd.f32 %v985_v26, %v570_v33 }
  0xf6   : > { %v586_v38 = vadd.f32 %v987_v27, %v585_v35 }
  0xf7   : > { %v575_v41 = vsel %vm574_vm12, %v985_v26, %v571_v37 }
  0xf8   : > { %v590_v42 = vsel %vm589_vm9, %v987_v27, %v586_v38  ;;  %v580_v43 = vsel %vm577_vm15, %v579_v39, %v575_v41 }
  0xf9   : > { %v595_v44 = vsel %vm592_vm4, %v594_v40, %v590_v42  ;;  %610 = vrot.lane.b32.xlu0 %v580_v43, %s1124_s4  ;;  %602 = vrot.lane.b32.xlu2 %v580_v43, %s1127_s11  ;;  %v623_v55 = vmul.f32 0.75, %v580_v43  ;;  %vm1571_vm4 = vcmask 7168  }
  0xfa   : > { %598 = vrot.lane.b32.xlu1 %v595_v44, %s1127_s11  ;;  %v624_v54 = vmul.f32 0.75, %v595_v44  ;;  %vm1572_vm9 = vmmov %vm1571_vm4 }
  0xfb   : > { %vm1577_vm13 = vmmov %vm1571_vm4 }
  0xfc   : > { %vm1578_vm14 = vmmov %vm1571_vm4 }
 0x102   : > { %612 = vrot.lane.b32.xlu1 %v595_v44, %s1124_s4  ;;  %s742_s4 = scalar_lea.hbm %s1545_s3, %s898_s30 }
 0x103   : > { %s746_s5 = sshll.u32 %s742_s4, 4  ;;  %s747_s5 = int_to_ptr.hbm [resolvable:$true] %s746_s5 }
 0x104   : > { %s1047_s9 = sshra.s32 %s747_s5, 4  ;;  %s1048_s9 = int_to_ptr.hbm [resolvable:$true] %s1047_s9 }
 0x105   : > { %s1049_s10 = scalar_lea.hbm %s1048_s9, 8  ;;  %p1054_p8 = scmp.lt.s32.totalorder %s1048_s9, %s1545_s3 }
 0x106   : > { %p1050_p1 = scmp.ne.s32.totalorder %s1048_s9, %s1049_s10  ;;  %p1055_p11 = scmp.lt.s32.totalorder %s1053_s12, %s1049_s10 }
 0x108   : > { %p1051_p2 = pnand %p1050_p1, %p1231_p9  ;;  %p1056_p12 = por %p1055_p11, %p1054_p8 }
 0x10a   : > { %p1052_p4 = pneg %p1051_p2 }
 0x10c   : > { %p1057_p13 = pnand %p1056_p12, %p1052_p4 }
 0x153   : > { %v603_v45 = vpop.permute.xlu2 %602 }
 0x16b   : > { %v611_v59 = vpop.permute.xlu0 %610 }
 0x16c   : > { %v599_v46 = vpop.permute.xlu1 %598 }
 0x16d   : > { %v604_v47 = vsel %vm422_vm10, %v603_v45, %v599_v46  ;;  %v607_v48 = vsel %vm422_vm10, %v599_v46, %v603_v45  ;;  %vm1474_vm10 = vcmp.lt.s32.totalorder %v362_v49, 256 }
 0x16e   : > { %v608_v50 = vsel %vm365_vm11, %v607_v48, %v580_v43  ;;  %v622_v51 = vmul.f32 0.25, %v604_v47  ;;  %vm1575_vm11 = vcmask 1040384  }
 0x16f   : > { %v621_v56 = vmul.f32 0.25, %v608_v50  ;;  %vm1576_vm15 = vmmov %vm1575_vm11 }
 0x170   : > { %v626_v57 = vadd.f32 %v624_v54, %v622_v51 }
 0x171   : > { %v625_v58 = vadd.f32 %v623_v55, %v621_v56 }
 0x172   : > { %632 = vrot.lane.b32.xlu2 %v626_v57, %s1128_s23  ;;  %v658_v9 = vmul.f32 0.75, %v626_v57 }
 0x173   : > { %644 = vrot.lane.b32.xlu1 %v625_v58, %s1123_s21  ;;  %636 = vrot.lane.b32.xlu0 %v625_v58, %s1128_s23  ;;  %v657_v24 = vmul.f32 0.75, %v625_v58 }
 0x174   : > { %v613_v61 = vpop.permute.xlu1 %612 }
 0x175   : > { %v614_v62 = vsel %vm500_vm1, %v611_v59, %v613_v61  ;;  %v618_v63 = vsel %vm500_vm1, %v613_v61, %v611_v59 }
 0x176   : > { %v620_v52 = vsel %vm368_vm0, %v618_v63, %v595_v44  ;;  %v627_v2 = vmul.f32 0.25, %v614_v62  ;;  %vm1569_vm0 = vcmask 1039360  }
 0x177   : > { %v628_v4 = vmul.f32 0.25, %v620_v52  ;;  %vm1570_vm1 = vmmov %vm1569_vm0 }
 0x178   : > { %v629_v5 = vadd.f32 %v627_v2, %v623_v55  ;;  %vm1581_vm2 = vmmov %vm1569_vm0 }
 0x179   : > { %v630_v7 = vadd.f32 %v628_v4, %v624_v54 }
 0x17a   : > { %646 = vrot.lane.b32.xlu2 %v626_v57, %s1123_s21  ;;  %v708_v41 = vmul.f32 0.75, %v629_v5 }
 0x17b   : > { %687 = vrot.lane.b32.xlu1 %v629_v5, %s1128_s23  ;;  %683 = vrot.lane.b32.xlu0 %v630_v7, %s1128_s23  ;;  %v709_v38 = vmul.f32 0.75, %v630_v7 }
 0x182   : > { %695 = vrot.lane.b32.xlu2 %v629_v5, %s1123_s21 }
 0x183   : > { %697 = vrot.lane.b32.xlu0 %v630_v7, %s1123_s21  ;;  %s219_s21 = scalar_lea.vmem [#allocation9], %s846_s27 }
 0x184   : > { %s744_s28 = sshll.u32 %s219_s21, 4  ;;  %s745_s28 = int_to_ptr.vmem [resolvable:$true] %s744_s28 }
 0x1cc   : > { %v633_v0 = vpop.permute.xlu2 %632 }
 0x1d4   : > { %v647_v1 = vpop.permute.xlu2 %646 }
 0x1dc   : > { %v696_v17 = vpop.permute.xlu2 %695 }
 0x1e5   : > { %v645_v10 = vpop.permute.xlu1 %644  ;;  %v637_v53 = vpop.permute.xlu0 %636 }
 0x1e6   : > { %v648_v11 = vsel %vm1569_vm0, %v645_v10, %v647_v1  ;;  %v652_v12 = vsel %vm1570_vm1, %v647_v1, %v645_v10  ;;  %v638_v13 = vsel %vm1571_vm4, %v637_v53, %v633_v0  ;;  %v641_v14 = vsel %vm1572_vm9, %v633_v0, %v637_v53 }
 0x1e7   : > { %v653_v15 = vsel %vm1387_vm8, %v648_v11, %v625_v58  ;;  %v654_v16 = vsel %vm1369_vm6, %v652_v12, %v626_v57  ;;  %v642_v18 = vsel %vm1382_vm7, %v641_v14, %v625_v58  ;;  %v643_v19 = vsel %vm1353_vm3, %v638_v13, %v626_v57 }
 0x1e8   : > { %v671_v20 = vmul.f32 0.25, %v653_v15  ;;  %v672_v21 = vmul.f32 0.25, %v654_v16  ;;  %v655_v22 = vmul.f32 0.25, %v642_v18  ;;  %v656_v23 = vmul.f32 0.25, %v643_v19 }
 0x1ea   : > { %v674_v25 = vadd.f32 %v672_v21, %v658_v9  ;;  %v660_v26 = vadd.f32 %v658_v9, %v656_v23  ;;  %v673_v6 = vadd.f32 %v671_v20, %v657_v24  ;;  %v659_v29 = vadd.f32 %v657_v24, %v655_v22 }
 0x1ec   : > { %v677_v28 = vrot.slane %v674_v25, 7  ;;  %v663_v30 = vrot.slane %v660_v26, 7 }
 0x1ed   : > { %v688_v31 = vpop.permute.xlu1 %687  ;;  %v684_v32 = vpop.permute.xlu0 %683 }
 0x1ee   : > { %v678_v33 = vsel %vm1575_vm11, %v673_v6, %v677_v28  ;;  %v664_v34 = vsel %vm1576_vm15, %v659_v29, %v663_v30  ;;  %v689_v35 = vsel %vm1577_vm13, %v688_v31, %v684_v32  ;;  %v692_v36 = vsel %vm1578_vm14, %v684_v32, %v688_v31 }
 0x1ef   : > { %v693_v49 = vsel %vm1382_vm7, %v692_v36, %v629_v5  ;;  %v694_v37 = vsel %vm1353_vm3, %v689_v35, %v630_v7  ;;  %670 = vst.msk [vmem:[%s219_s21] ss:$4 sm:$0x3] %vm1474_vm10, %v664_v34  ;;  %vm1579_vm7 = vmmov %vm1575_vm11 }
 0x1f0   : > { %v706_v39 = vmul.f32 0.25, %v693_v49  ;;  %v707_v40 = vmul.f32 0.25, %v694_v37  ;;  %889 = vst.msk [vmem:[%s219_s21 + $0x1] ss:$4 sm:$0x3] %vm1474_vm10, %v678_v33  ;;  %vm1580_vm3 = vmmov %vm1569_vm0 }
 0x1f2   : > { %v711_v42 = vadd.f32 %v709_v38, %v707_v40  ;;  %v710_v43 = vadd.f32 %v708_v41, %v706_v39 }
 0x1f4   : > { %v714_v44 = vrot.slane %v711_v42, 7 }
 0x1f5   : > { %v698_v45 = vpop.permute.xlu0 %697 }
 0x1f6   : > { %v715_v60 = vsel %vm1579_vm7, %v710_v43, %v714_v44  ;;  %v699_v46 = vsel %vm1580_vm3, %v696_v17, %v698_v45  ;;  %v703_v47 = vsel %vm1581_vm2, %v698_v45, %v696_v17 }
 0x1f7   : > { %v704_v48 = vsel %vm1387_vm8, %v699_v46, %v629_v5  ;;  %v705_v50 = vsel %vm1369_vm6, %v703_v47, %v630_v7  ;;  %890 = vst.msk [vmem:[%s219_s21 + $0x2] ss:$4 sm:$0x3] %vm1474_vm10, %v715_v60  ;;  %vm1582_vm8 = vmmov %vm1579_vm7 }
 0x1f8   : > { %v719_v51 = vmul.f32 0.25, %v704_v48  ;;  %v720_v54 = vmul.f32 0.25, %v705_v50 }
 0x1fa   : > { %v722_v55 = vadd.f32 %v720_v54, %v709_v38  ;;  %v721_v56 = vadd.f32 %v719_v51, %v708_v41 }
 0x1fc   : > { %v725_v3 = vrot.slane %v722_v55, 7 }
 0x1fe   : > { %v726_v8 = vsel %vm1582_vm8, %v721_v56, %v725_v3 }
 0x1ff   : > { %891 = vst.msk [vmem:[%s219_s21 + $0x3] ss:$4 sm:$0x3] %vm1474_vm10, %v726_v8 }
 0x200   : > { %1060 = shalt.err (!%p1057_p13)
}
 0x201   : > { %905 = dma.vmem_to_hbm [thread:$0]  (%p1231_p9), %s745_s28, 128, %s747_s5, %s731_s7  }
 0x202 PF: > { %s758_s26 = sand.u32 1, %s1099_s14   ;;  %p1583_p0 = scmp.ge.s32.totalorder %s1119_s19, 2 }
 0x203   : > { %s759_s20 = scalar_lea.sflag [#allocation6], %s758_s26 }
 0x204   : > { %p916_p3 = pnand %p1583_p0, %p1202_p6 }
 0x206   : > { %p917_p5 = pneg %p916_p3 }
 0x208   : > { %1094 = dma.done.wait (%p917_p5), %s759_s20, 128  }
 0x209   : > { %1096 = vsyncadd (%p917_p5), %s759_s20, 4294967168  ;;  %s21_s19 = sadd.s32 1, %s1119_s19   ;;  %s1584_s14 = smov %s1103_s15 }
 0x20a   : > { %p18_p7 = scmp.ge.s32.totalorder %s21_s19, 4   ;;  %s1585_s15 = smov %s1107_s16 }
 0x20b   : > { %s1586_s16 = smov %s1237_s8  ;;  %s1587_s17 = smov %s1115_s18 }
 0x20c   : > { %s1588_s18 = smov %s1590_s29  ;;  %20 = sbr.rel (!%p18_p7) target bundleno = 9 (0x9), region = 88 }
 0x211   :  { %765 = vsyncpa [#allocation5], 1 }
 0x212   :  { %767 = vsyncpa [#allocation5 + $0x1], 1 }
 0x213   :  { %768 = vsyncpa [#allocation6], 1 }
 0x214   :  { %770 = vsyncpa [#allocation6 + $0x1], 1 }
 0x215   :  { %771 = vsyncpa [#allocation7], 1 }
 0x216   :  { %773 = vsyncpa [#allocation7 + $0x1], 1 }

</bundles_post_ra>
